<compile_context>
chip_gen: v6e
topology: v6e:2x2x1
jax: 0.10.0
libtpu: 0.0.40
codegen_flags: <defaults>
</compile_context>

<pallas_src>
import functools

import jax
import jax.numpy as jnp
from jax.experimental import pallas as pl
from jax.experimental.pallas import tpu as pltpu

EPS = 1e-9
LANE = 128
_MIN_GRID_STEPS = 8  # keep megacore split + DMA double-buffering busy

_TPU_VMEM_CAP = None


def _vmem_capacity_bytes():
    """Physical VMEM per TensorCore; conservative (v7x = 64 MiB) fallback."""
    global _TPU_VMEM_CAP
    if _TPU_VMEM_CAP is None:
        cap = 0
        try:
            info = pltpu.get_tpu_info()
            cap = int(getattr(info, "vmem_capacity_bytes", 0) or 0)
        except Exception:
            cap = 0
        _TPU_VMEM_CAP = cap if cap > 0 else 64 * 1024 * 1024
    return _TPU_VMEM_CAP


def _vmem_budgets():
    """(streamed-bytes budget per step, scoped vmem_limit_bytes), generation aware."""
    cap = _vmem_capacity_bytes()
    if cap <= 64 * 1024 * 1024:                 # v7x-class: 64 MiB physical per TC
        return 12 * 1024 * 1024, 32 * 1024 * 1024
    return 24 * 1024 * 1024, 64 * 1024 * 1024   # v5e / v6e: 128 MiB physical


def _largest_divisor_leq(n, k):
    k = max(1, min(n, k))
    for d in range(k, 0, -1):
        if n % d == 0:
            return d
    return 1


def _pick_slab_tiles(n, c, s_total, x_bytes, t_bytes, m_bytes, budget):
    """Pick (nb, ts) for the (nb, C, ts, 128) slab blocks."""
    # Per sublane-row bytes of one grid step: x+t(+mask) double-buffered plus ~2
    # block-sized f32 intermediates the compiler keeps live.
    row_bytes = 2 * (c * LANE * (x_bytes + t_bytes) + LANE * m_bytes) + 2 * c * LANE * 4
    cap_rows = max(8, budget // row_bytes)
    if s_total <= cap_rows:
        ts = s_total
        nb = _largest_divisor_leq(n, cap_rows // max(1, s_total))
    else:
        nb = 1
        ts = max(8, (cap_rows // 8) * 8)
        # Prefer a multiple-of-8 divisor of s_total near the cap (no ragged tail).
        for cand in range(ts, max(8, ts // 2) - 1, -8):
            if s_total % cand == 0:
                ts = cand
                break
        ts = min(ts, s_total)

    def _steps(nb_, ts_):
        return (n // nb_) * (-(-s_total // ts_))

    while _steps(nb, ts) < _MIN_GRID_STEPS:
        if nb > 1:
            nb = _largest_divisor_leq(n, nb // 2)
        elif ts > 8:
            new_ts = max(8, ((ts // 2) // 8) * 8)
            if new_ts == ts:
                break
            ts = new_ts
        else:
            break
    return int(nb), int(ts)


def _pick_lane_tiles(n, c, hw, x_bytes, t_bytes, m_bytes, budget):
    """Pick (nb, t_hw) for the (nb, C, t_hw) lane-layout fallback blocks."""
    lane_bytes = 2 * (c * (x_bytes + t_bytes) + m_bytes) + 2 * c * 4
    cap = max(LANE, budget // lane_bytes)
    if hw <= cap:
        t_hw = hw
        nb = _largest_divisor_leq(n, cap // max(1, hw))
    else:
        nb = 1
        t_hw = max(LANE, (cap // LANE) * LANE)

    def _steps(nb_, t_):
        return (n // nb_) * (-(-hw // t_))

    while _steps(nb, t_hw) < _MIN_GRID_STEPS:
        if nb > 1:
            nb = _largest_divisor_leq(n, nb // 2)
        elif t_hw > LANE:
            new_t = max(LANE, ((t_hw // 2) // LANE) * LANE)
            if new_t == t_hw:
                break
            t_hw = new_t
        else:
            break
    return int(nb), int(t_hw)


def _soft_ce(x, t, axis, keepdims):
    """Per-position soft cross entropy: sum_c -t * log_softmax(x) along `axis`."""
    mx = jnp.max(x, axis=axis, keepdims=True)
    xs = x - mx                                                  # matches `input - maxRow`
    lse = jnp.log(jnp.sum(jnp.exp(xs), axis=axis, keepdims=True))
    return jnp.sum(-t * (xs - lse), axis=axis, keepdims=keepdims)


# -------------------- slab kernels: blocks (nb, C, ts, 128), class axis = 1 -----------


def _slab_kernel(x_ref, t_ref, loss_ref, *, s_total, ragged):
    x = x_ref[...].astype(jnp.float32)
    t = t_ref[...].astype(jnp.float32)
    ce = _soft_ce(x, t, axis=1, keepdims=False)                  # (nb, ts, 128), VALU only
    if ragged:  # static specialization: only emitted when S % ts != 0
        ts = ce.shape[1]
        row = pl.program_id(1) * ts + jax.lax.broadcasted_iota(jnp.int32, ce.shape, 1)
        ce = jnp.where(row < s_total, ce, 0.0)                   # select stops NaN/Inf tails
    loss_ref[...] = jnp.sum(ce).reshape(1, 1)


def _slab_kernel_masked(x_ref, t_ref, m_ref, loss_ref, msum_ref, *, s_total, ragged):
    x = x_ref[...].astype(jnp.float32)
    t = t_ref[...].astype(jnp.float32)
    m = m_ref[...].astype(jnp.float32)                           # (nb, ts, 128)
    ce = _soft_ce(x, t, axis=1, keepdims=False)
    if ragged:
        ts = ce.shape[1]
        row = pl.program_id(1) * ts + jax.lax.broadcasted_iota(jnp.int32, ce.shape, 1)
        valid = row < s_total
        ce = jnp.where(valid, ce, 0.0)
        m = jnp.where(valid, m, 0.0)
    loss_ref[...] = jnp.sum(ce * m).reshape(1, 1)
    msum_ref[...] = jnp.sum(m).reshape(1, 1)


# ----------------- lane-layout fallback kernels: blocks (nb, C, t_hw) -----------------


def _lane_kernel(x_ref, t_ref, loss_ref, *, hw, ragged):
    x = x_ref[...].astype(jnp.float32)
    t = t_ref[...].astype(jnp.float32)
    ce = _soft_ce(x, t, axis=1, keepdims=True)                   # (nb, 1, t_hw)
    if ragged:
        thw = ce.shape[-1]
        col = pl.program_id(1) * thw + jax.lax.broadcasted_iota(jnp.int32, ce.shape, 2)
        ce = jnp.where(col < hw, ce, 0.0)
    loss_ref[...] = jnp.sum(ce).reshape(1, 1)


def _lane_kernel_masked(x_ref, t_ref, m_ref, loss_ref, msum_ref, *, hw, ragged):
    x = x_ref[...].astype(jnp.float32)
    t = t_ref[...].astype(jnp.float32)
    m = m_ref[...].astype(jnp.float32)                           # (nb, 1, t_hw)
    ce = _soft_ce(x, t, axis=1, keepdims=True)
    if ragged:
        thw = ce.shape[-1]
        col = pl.program_id(1) * thw + jax.lax.broadcasted_iota(jnp.int32, ce.shape, 2)
        valid = col < hw
        ce = jnp.where(valid, ce, 0.0)
        m = jnp.where(valid, m, 0.0)
    loss_ref[...] = jnp.sum(ce * m).reshape(1, 1)
    msum_ref[...] = jnp.sum(m).reshape(1, 1)


# ------------------------------------ wrapper -----------------------------------------


@functools.partial(
    jax.jit,
    static_argnames=("target_channels_first", "tile_batch", "tile_sublanes", "tile_lanes"))
def _soft_label_loss_impl(inp, target, mask, target_channels_first,
                          tile_batch, tile_sublanes, tile_lanes):
    # ---- layout plumbing: NCHW input is consumed natively as (N, C, HW); only the
    # ---- flattened (M, C) target path pays one fused XLA transpose (own dtype).
    if inp.ndim > 2:
        N, C = int(inp.shape[0]), int(inp.shape[1])
        HW = 1
        for d in inp.shape[2:]:
            HW *= int(d)
        x3 = inp.reshape(N, C, HW)
    else:
        # TODO(synk): a dedicated (rows, C)-layout kernel would avoid this transpose on
        # the already-flat 2-D input path (uncommon).
        M0, C = int(inp.shape[0]), int(inp.shape[1])
        N, HW = 1, M0
        x3 = jnp.transpose(inp, (1, 0)).reshape(1, C, HW)
    M = N * HW

    if target_channels_first is None:
        channels_first = (target.ndim > 2 and int(target.shape[0]) == N
                          and int(target.shape[1]) == C and target.size == M * C)
    else:
        channels_first = bool(target_channels_first)
    if channels_first:
        t3 = target.reshape(N, C, HW)                 # same layout as input: no transpose
    else:
        t3 = jnp.transpose(target.reshape(N, HW, C), (0, 2, 1))

    m_arr = None
    if mask is not None:
        m_arr = mask
        if not jnp.issubdtype(m_arr.dtype, jnp.floating):
            m_arr = m_arr.astype(jnp.float32)

    stream_budget, vmem_limit = _vmem_budgets()
    x_b, t_b = x3.dtype.itemsize, t3.dtype.itemsize
    m_b = m_arr.dtype.itemsize if m_arr is not None else 0

    cparams = pltpu.CompilerParams(
        # No cross-step accumulator -> both grid axes independent (megacore friendly).
        dimension_semantics=("parallel", "parallel"),
        vmem_limit_bytes=vmem_limit,
    )

    if HW % LANE == 0:
        # ------------------ slab fast path: (N, C, S, 128), class axis elementwise ----
        S = HW // LANE
        nb, ts = _pick_slab_tiles(N, C, S, x_b, t_b, m_b, stream_budget)
        if tile_batch is not None:
            nb = _largest_divisor_leq(N, int(tile_batch))
        if tile_sublanes is not None:
            ts = max(1, min(int(tile_sublanes), S))
            if ts != S:
                ts = min(S, max(8, (ts // 8) * 8))
        ragged = (S % ts) != 0
        NB, SB = N // nb, -(-S // ts)
        grid = (NB, SB)

        x4 = x3.reshape(N, C, S, LANE)
        t4 = t3.reshape(N, C, S, LANE)
        x_spec = pl.BlockSpec((nb, C, ts, LANE), lambda n, s: (n, 0, s, 0))
        t_spec = pl.BlockSpec((nb, C, ts, LANE), lambda n, s: (n, 0, s, 0))
        part_spec = pl.BlockSpec((None, None, 1, 1), lambda n, s: (n, s, 0, 0))
        part_shape = jax.ShapeDtypeStruct((NB, SB, 1, 1), jnp.float32)

        n_out = 2 if m_arr is not None else 1
        cost = pl.CostEstimate(
            flops=int(8 * M * C),
            transcendentals=int(M * (C + 1)),
            bytes_accessed=int(x4.size * x_b + t4.size * t_b
                               + (M * m_b if m_arr is not None else 0)
                               + n_out * NB * SB * 4))

        if m_arr is None:
            parts = pl.pallas_call(
                functools.partial(_slab_kernel, s_total=S, ragged=ragged),
                out_shape=part_shape, grid=grid,
                in_specs=[x_spec, t_spec], out_specs=part_spec,
                compiler_params=cparams, cost_estimate=cost,
            )(x4, t4)
            return jnp.sum(parts) / jnp.float32(M)

        m3 = m_arr.reshape(N, S, LANE)                # lane-dense mask stream
        m_spec = pl.BlockSpec((nb, ts, LANE), lambda n, s: (n, s, 0))
        loss_p, msum_p = pl.pallas_call(
            functools.partial(_slab_kernel_masked, s_total=S, ragged=ragged),
            out_shape=(part_shape, part_shape), grid=grid,
            in_specs=[x_spec, t_spec, m_spec], out_specs=[part_spec, part_spec],
            compiler_params=cparams, cost_estimate=cost,
        )(x4, t4, m3)
        # mean(ce*mask) * (M / (mask.sum()+eps)) == sum(ce*mask) / (mask.sum()+eps)
        return jnp.sum(loss_p) / (jnp.sum(msum_p) + EPS)

    # ------------------ lane-layout fallback: (N, C, HW), class on sublanes -----------
    nb, t_hw = _pick_lane_tiles(N, C, HW, x_b, t_b, m_b, stream_budget)
    if tile_batch is not None:
        nb = _largest_divisor_leq(N, int(tile_batch))
    if tile_lanes is not None:
        t_hw = max(1, min(int(tile_lanes), HW))
        if t_hw != HW:
            t_hw = min(HW, max(LANE, (t_hw // LANE) * LANE))
    ragged = (HW % t_hw) != 0
    NB, JB = N // nb, -(-HW // t_hw)
    grid = (NB, JB)

    x_spec = pl.BlockSpec((nb, C, t_hw), lambda n, j: (n, 0, j))
    t_spec = pl.BlockSpec((nb, C, t_hw), lambda n, j: (n, 0, j))
    part_spec = pl.BlockSpec((None, None, 1, 1), lambda n, j: (n, j, 0, 0))
    part_shape = jax.ShapeDtypeStruct((NB, JB, 1, 1), jnp.float32)

    n_out = 2 if m_arr is not None else 1
    cost = pl.CostEstimate(
        flops=int(8 * M * C),
        transcendentals=int(M * (C + 1)),
        bytes_accessed=int(x3.size * x_b + t3.size * t_b
                           + (M * m_b if m_arr is not None else 0)
                           + n_out * NB * JB * 4))

    if m_arr is None:
        parts = pl.pallas_call(
            functools.partial(_lane_kernel, hw=HW, ragged=ragged),
            out_shape=part_shape, grid=grid,
            in_specs=[x_spec, t_spec], out_specs=part_spec,
            compiler_params=cparams, cost_estimate=cost,
        )(x3, t3)
        return jnp.sum(parts) / jnp.float32(M)

    m3 = m_arr.reshape(N, 1, HW)
    m_spec = pl.BlockSpec((nb, 1, t_hw), lambda n, j: (n, 0, j))
    loss_p, msum_p = pl.pallas_call(
        functools.partial(_lane_kernel_masked, hw=HW, ragged=ragged),
        out_shape=(part_shape, part_shape), grid=grid,
        in_specs=[x_spec, t_spec, m_spec], out_specs=[part_spec, part_spec],
        compiler_params=cparams, cost_estimate=cost,
    )(x3, t3, m3)
    return jnp.sum(loss_p) / (jnp.sum(msum_p) + EPS)


def soft_label_loss(inp, target, mask=None, *, target_channels_first=None,
                    tile_batch=None, tile_sublanes=None, tile_lanes=None):
    """JAX/Pallas equivalent of SoftLabelLoss.forward(input, target, mask).

    `target` may be given flattened as (N*H*W, C) (as the PyTorch module expects) or in
    the same (N, C, ...) layout as `input` (fast path: no transpose at all).  Pass
    `target_channels_first` explicitly to disambiguate ambiguous shapes.
    """
    return _soft_label_loss_impl(inp, target, mask,
                                 target_channels_first=target_channels_first,
                                 tile_batch=tile_batch,
                                 tile_sublanes=tile_sublanes,
                                 tile_lanes=tile_lanes)


def _reference(inp, target, mask=None):
    """Pure-JAX reference mirroring the PyTorch module."""
    if inp.ndim > 2:
        N, C = inp.shape[0], inp.shape[1]
        x = jnp.transpose(inp.reshape(N, C, -1), (0, 2, 1)).reshape(-1, C)
    else:
        x = inp
    x = x.astype(jnp.float32)
    x = x - jnp.max(x, axis=1, keepdims=True)
    logp = jax.nn.log_softmax(x, axis=1)
    t = target
    if t.ndim > 2:  # NCHW-style target
        t = jnp.transpose(t.reshape(t.shape[0], t.shape[1], -1),
                          (0, 2, 1)).reshape(-1, t.shape[1])
    result = jnp.sum(-t.astype(jnp.float32) * logp, axis=1)
    if mask is not None:
        m = mask.reshape(-1).astype(jnp.float32)
        result = result * m
        return jnp.mean(result) * (m.shape[0] / (jnp.sum(m) + EPS))
    return jnp.mean(result)


if __name__ == "__main__":
    key = jax.random.PRNGKey(0)
    ks = jax.random.split(key, 8)

    # 1-3) N=2, C=4, 16x16 (HW=256 -> slab layout path, no ragged tail)
    N, C, H, W = 2, 4, 16, 16
    M = N * H * W
    x = jax.random.normal(ks[0], (N, C, H, W), dtype=jnp.float32)
    t = jax.nn.softmax(jax.random.normal(ks[1], (M, C), dtype=jnp.float32), axis=1)
    mask = (jax.random.uniform(ks[2], (M,)) > 0.3).astype(jnp.float32)

    out = jax.block_until_ready(soft_label_loss(x, t))
    ref = _reference(x, t)
    assert jnp.allclose(out, ref, rtol=1e-5, atol=1e-5), (out, ref)

    out_m = jax.block_until_ready(soft_label_loss(x, t, mask))
    ref_m = _reference(x, t, mask)
    assert jnp.allclose(out_m, ref_m, rtol=1e-5, atol=1e-5), (out_m, ref_m)

    t_nchw = jnp.transpose(t.reshape(N, H * W, C), (0, 2, 1)).reshape(N, C, H, W)
    out_f = jax.block_until_ready(soft_label_loss(x, t_nchw, mask))
    assert jnp.allclose(out_f, ref_m, rtol=1e-5, atol=1e-5), (out_f, ref_m)

    # 4) ragged slab path: HW=1536 -> S=12, forced ts=8 (12 % 8 != 0), masked
    H2, W2 = 48, 32
    M2 = N * H2 * W2
    x2 = jax.random.normal(ks[3], (N, C, H2, W2), dtype=jnp.float32)
    t2 = jax.nn.softmax(jax.random.normal(ks[4], (M2, C), dtype=jnp.float32), axis=1)
    mask2 = (jax.random.uniform(ks[5], (M2,)) > 0.5).astype(jnp.float32)
    out_r = jax.block_until_ready(soft_label_loss(x2, t2, mask2, tile_sublanes=8))
    ref_r = _reference(x2, t2, mask2)
    assert jnp.allclose(out_r, ref_r, rtol=1e-5, atol=1e-5), (out_r, ref_r)

    # 5) ragged lane fallback path: HW=324 (not a multiple of 128), 128-lane tiles
    H3 = W3 = 18
    M3 = N * H3 * W3
    x5 = jax.random.normal(ks[6], (N, C, H3, W3), dtype=jnp.float32)
    t5 = jax.nn.softmax(jax.random.normal(ks[7], (M3, C), dtype=jnp.float32), axis=1)
    out_l = jax.block_until_ready(soft_label_loss(x5, t5, tile_lanes=128))
    ref_l = _reference(x5, t5)
    assert jnp.allclose(out_l, ref_l, rtol=1e-5, atol=1e-5), (out_l, ref_l)

    # 6) already-flat 2-D input path (M, C)
    x_flat = jnp.transpose(x.reshape(N, C, -1), (0, 2, 1)).reshape(-1, C)
    out_2d = jax.block_until_ready(soft_label_loss(x_flat, t, mask))
    assert jnp.allclose(out_2d, ref_m, rtol=1e-5, atol=1e-5), (out_2d, ref_m)

    # 7) bf16 inputs (kernel upcasts on the VPU; halves HBM traffic on v5e/v6e)
    x_bf = x.astype(jnp.bfloat16)
    t_bf = t.astype(jnp.bfloat16)
    out_bf = jax.block_until_ready(soft_label_loss(x_bf, t_bf))
    ref_bf = _reference(x_bf, t_bf)
    assert jnp.allclose(out_bf, ref_bf, rtol=1e-3, atol=1e-3), (out_bf, ref_bf)

    print("KERNEL_OK")
</pallas_src>

<mosaic_0001>
module attributes {stable_mosaic.version = 11 : i64} {
  func.func @_slab_kernel(%arg0: i32, %arg1: i32, %arg2: memref<1x4x2x128xf32, #tpu.memory_space<vmem>>, %arg3: memref<1x4x2x128xf32, #tpu.memory_space<vmem>>, %arg4: memref<1x1x1x1xf32, #tpu.memory_space<vmem>>) attributes {dimension_semantics = [#tpu.dimension_semantics<parallel>, #tpu.dimension_semantics<parallel>], iteration_bounds = array<i64: 2, 1>, scalar_prefetch = 0 : i64, scratch_operands = 0 : i64, tpu.core_type = #tpu.core_type<tc>, window_params = [{transform_indices = @transform_0, window_bounds = array<i64: 1, 4, 2, 128>}, {transform_indices = @transform_1, window_bounds = array<i64: 1, 4, 2, 128>}, {transform_indices = @transform_2, window_bounds = array<i64: 1, 1, 1, 1>}]} {
    %c0 = arith.constant 0 : index
    %c0_0 = arith.constant 0 : index
    %c0_1 = arith.constant 0 : index
    %c0_2 = arith.constant 0 : index
    %0 = vector.load %arg2[%c0, %c0_0, %c0_1, %c0_2] : memref<1x4x2x128xf32, #tpu.memory_space<vmem>>, vector<1x4x2x128xf32>
    %c0_3 = arith.constant 0 : index
    %c0_4 = arith.constant 0 : index
    %c0_5 = arith.constant 0 : index
    %c0_6 = arith.constant 0 : index
    %1 = vector.load %arg3[%c0_3, %c0_4, %c0_5, %c0_6] : memref<1x4x2x128xf32, #tpu.memory_space<vmem>>, vector<1x4x2x128xf32>
    %cst = arith.constant dense<0xFF800000> : vector<1x2x128xf32>
    %2 = vector.multi_reduction <maximumf>, %0, %cst [1] : vector<1x4x2x128xf32> to vector<1x2x128xf32>
    %3 = vector.shape_cast %2 : vector<1x2x128xf32> to vector<1x1x2x128xf32>
    %4 = vector.broadcast %3 : vector<1x1x2x128xf32> to vector<1x4x2x128xf32>
    %5 = arith.subf %0, %4 : vector<1x4x2x128xf32>
    %6 = math.exp %5 : vector<1x4x2x128xf32>
    %cst_7 = arith.constant dense<0.000000e+00> : vector<1x2x128xf32>
    %7 = vector.multi_reduction <add>, %6, %cst_7 [1] : vector<1x4x2x128xf32> to vector<1x2x128xf32>
    %8 = vector.shape_cast %7 : vector<1x2x128xf32> to vector<1x1x2x128xf32>
    %9 = math.log %8 : vector<1x1x2x128xf32>
    %cst_8 = arith.constant 0.000000e+00 : f32
    %10 = vector.broadcast %cst_8 : f32 to vector<1x4x2x128xf32>
    %11 = arith.subf %10, %1 : vector<1x4x2x128xf32>
    %12 = vector.broadcast %9 : vector<1x1x2x128xf32> to vector<1x4x2x128xf32>
    %13 = arith.subf %5, %12 : vector<1x4x2x128xf32>
    %14 = arith.mulf %11, %13 : vector<1x4x2x128xf32>
    %cst_9 = arith.constant dense<0.000000e+00> : vector<1x2x128xf32>
    %15 = vector.multi_reduction <add>, %14, %cst_9 [1] : vector<1x4x2x128xf32> to vector<1x2x128xf32>
    %16 = vector.shape_cast %15 : vector<1x2x128xf32> to vector<1x1x2x128xf32>
    %cst_10 = arith.constant dense<0.000000e+00> : vector<1xf32>
    %17 = vector.multi_reduction <add>, %16, %cst_10 [1, 2, 3] : vector<1x1x2x128xf32> to vector<1xf32>
    %18 = vector.shape_cast %17 : vector<1xf32> to vector<1x1x1x1xf32>
    %19 = vector.extract %18[0, 0, 0, 0] : f32 from vector<1x1x1x1xf32>
    %20 = vector.broadcast %19 : f32 to vector<1x1xf32>
    %c0_11 = arith.constant 0 : index
    %c0_12 = arith.constant 0 : index
    %c0_13 = arith.constant 0 : index
    %c0_14 = arith.constant 0 : index
    %21 = vector.load %arg4[%c0_11, %c0_12, %c0_13, %c0_14] : memref<1x1x1x1xf32, #tpu.memory_space<vmem>>, vector<1x1x1x1xf32>
    %22 = vector.shape_cast %21 : vector<1x1x1x1xf32> to vector<1x1xf32>
    %23 = vector.shape_cast %20 : vector<1x1xf32> to vector<1x1x1x1xf32>
    tpu.vector_store %arg4[%c0_11, %c0_12, %c0_13, %c0_14], %23 {strides = array<i32>} : memref<1x1x1x1xf32, #tpu.memory_space<vmem>>, vector<1x1x1x1xf32>,
    return
  }
  func.func @transform_0(%arg0: i32, %arg1: i32) -> (i32, i32, i32, i32) {
    %c0_i32 = arith.constant 0 : i32
    %c0_i32_0 = arith.constant 0 : i32
    %c0_i32_1 = arith.constant 0 : i32
    return %arg0, %c0_i32, %arg1, %c0_i32_0 : i32, i32, i32, i32
  }
  func.func @transform_1(%arg0: i32, %arg1: i32) -> (i32, i32, i32, i32) {
    %c0_i32 = arith.constant 0 : i32
    %c0_i32_0 = arith.constant 0 : i32
    %c0_i32_1 = arith.constant 0 : i32
    return %arg0, %c0_i32, %arg1, %c0_i32_0 : i32, i32, i32, i32
  }
  func.func @transform_2(%arg0: i32, %arg1: i32) -> (i32, i32, i32, i32) {
    %c0_i32 = arith.constant 0 : i32
    %c0_i32_0 = arith.constant 0 : i32
    %c0_i32_1 = arith.constant 0 : i32
    return %arg0, %arg1, %c0_i32, %c0_i32_0 : i32, i32, i32, i32
  }
}

</mosaic_0001>

<bundles_post_ra>
// kernel: _soft_label_loss_impl.1
= control target key start
LH: loop header
LB: loop body
LE: loop exit
PB: predicated region body
PF: predicated region fallthrough
CT: control target
= control target key end

     0   :  { %s448_s9 = smov 0   ;;  %s450_s10 = smov 0   ;;  %s505_s0 = inlined_call_operand.vmem [shape: f32[2,4,2,128], index: 0, kind: input, shape index: {}]   ;;  %s506_s1 = inlined_call_operand.vmem [shape: f32[2,4,2,128], index: 1, kind: input, shape index: {}]   ;;  %s507_s2 = inlined_call_operand.vmem [shape: f32[2,1,1,1], index: 2, kind: output, shape index: {}]  }
   0x1   :  { %s452_s11 = smov 0  }
   0x2 LB: > { %s24_s12 = sadd.s32 1, %s427_s10  ;;  %p364_p0 = scmp.ge.s32.totalorder %s431_s11, 1  ;;  %s431_s11 = sphi %s452_s11, %s12_s11   ;;  %s427_s10 = sphi %s450_s10, %s509_s10   ;;  %s423_s9 = sphi %s448_s9, %s508_s9  }
   0x3   : > { %p26_p1 = scmp.ge.s32.totalorder %s24_s12, 2  ;;  %p146_p2 = scmp.lt.s32.totalorder %s431_s11, 3 }
   0x5   : > { %s511_s12 = smov (%p26_p1, %s24_s12), 0  ;;  %p147_p3 = pnand %p364_p0, %p146_p2 }
   0x6   : > { %p180_p4 = scmp.lt.s32.totalorder (!%p147_p3), %s423_s9, 1 }
   0x7   : > { %150 = sbr.rel (%p147_p3) target bundleno = 278 (0x116), region = 28 }
   0xc   : > { %s513_s9 = smov (!%p180_p4, %s423_s9), 1  ;;  %vm210_vm0 = vcmask 1041408   ;;  %vm269_vm1 = vcmask 0  }
   0xd   : > { %s371_s13 = sshll.u32 %s513_s9, 3  ;;  %s201_s22 = scalar_lea.vmem %s507_s2, %s513_s9 }
   0xe   : > { %s187_s16 = scalar_lea.vmem %s505_s0, %s371_s13  ;;  %s195_s19 = scalar_lea.vmem %s506_s1, %s371_s13 }
   0xf   : > { %v202_v0 = vld [vmem:[%s187_s16] sm:$0x3]  ;;  %v203_v1 = vld [vmem:[%s187_s16 + $0x2] sm:$0x3]  ;;  %v204_v2 = vld [vmem:[%s187_s16 + $0x4] sm:$0x3] }
  0x10   : > { %v205_v3 = vld [vmem:[%s187_s16 + $0x6] sm:$0x3]  ;;  %v211_v4 = vsel %vm210_vm0, %v202_v0, -inf  ;;  %v212_v5 = vsel %vm210_vm0, %v203_v1, -inf  ;;  %v213_v6 = vsel %vm210_vm0, %v204_v2, -inf }
  0x11   : > { %v214_v7 = vsel %vm210_vm0, %v205_v3, -inf  ;;  %v215_v8 = vmax.f32 %v211_v4, %v212_v5  ;;  %v206_v30 = vld [vmem:[%s195_s19] sm:$0x3]  ;;  %v207_v31 = vld [vmem:[%s195_s19 + $0x2] sm:$0x3] }
  0x12   : > { %v216_v9 = vmax.f32 %v213_v6, %v214_v7  ;;  %v208_v32 = vld [vmem:[%s195_s19 + $0x4] sm:$0x3]  ;;  %v209_v33 = vld [vmem:[%s195_s19 + $0x6] sm:$0x3]  ;;  %v239_v35 = vsub.f32 0.0, %v206_v30  ;;  %v240_v37 = vsub.f32 0.0, %v207_v31 }
  0x13   : > { %v241_v38 = vsub.f32 0.0, %v208_v32  ;;  %v242_v39 = vsub.f32 0.0, %v209_v33 }
  0x14   : > { %v217_v10 = vmax.f32 %v215_v8, %v216_v9 }
  0x16   : > { %v218_v11 = vsub.f32 %v202_v0, %v217_v10  ;;  %v219_v12 = vsub.f32 %v203_v1, %v217_v10  ;;  %v220_v13 = vsub.f32 %v204_v2, %v217_v10  ;;  %v221_v14 = vsub.f32 %v205_v3, %v217_v10 }
  0x18   : > { %v222_v15 = vmul.f32 1.442695, %v218_v11  ;;  %v224_v16 = vmul.f32 1.442695, %v219_v12  ;;  %v226_v17 = vmul.f32 1.442695, %v220_v13 }
  0x19   : > { %v228_v18 = vmul.f32 1.442695, %v221_v14 }
  0x1a   : > { %399 = vpow2.f32 %v222_v15 }
  0x1b   : > { %401 = vpow2.f32 %v224_v16 }
  0x1c   : > { %403 = vpow2.f32 %v226_v17 }
  0x1d   : > { %405 = vpow2.f32 %v228_v18 }
  0x27   : > { %v400_v19 = vpop.eup %399 }
  0x28   : > { %v402_v20 = vpop.eup %401  ;;  %v230_v21 = vsel %vm210_vm0, %v400_v19, 0.0 }
  0x29   : > { %v404_v22 = vpop.eup %403  ;;  %v231_v23 = vsel %vm210_vm0, %v402_v20, 0.0 }
  0x2a   : > { %v406_v24 = vpop.eup %405  ;;  %v232_v25 = vadd.f32 %v231_v23, %v230_v21  ;;  %v233_v26 = vsel %vm210_vm0, %v404_v22, 0.0 }
  0x2b   : > { %v235_v27 = vsel %vm210_vm0, %v406_v24, 0.0 }
  0x2c   : > { %v234_v28 = vadd.f32 %v233_v26, %v232_v25 }
  0x2e   : > { %v236_v29 = vadd.f32 %v235_v27, %v234_v28 }
  0x30   : > { %407 = vlog2.f32 %v236_v29 }
  0x3d   : > { %v408_v34 = vpop.eup %407 }
  0x3e   : > { %v238_v36 = vmul.f32 0.6931472, %v408_v34 }
  0x40   : > { %v243_v40 = vsub.f32 %v218_v11, %v238_v36  ;;  %v244_v41 = vsub.f32 %v219_v12, %v238_v36  ;;  %v245_v42 = vsub.f32 %v220_v13, %v238_v36  ;;  %v246_v43 = vsub.f32 %v221_v14, %v238_v36 }
  0x42   : > { %v247_v44 = vmul.f32 %v243_v40, %v239_v35  ;;  %v248_v45 = vmul.f32 %v244_v41, %v240_v37  ;;  %v249_v46 = vmul.f32 %v245_v42, %v241_v38  ;;  %v250_v47 = vmul.f32 %v246_v43, %v242_v39 }
  0x44   : > { %v251_v48 = vsel %vm210_vm0, %v247_v44, 0.0  ;;  %v252_v49 = vsel %vm210_vm0, %v248_v45, 0.0  ;;  %v254_v50 = vsel %vm210_vm0, %v249_v46, 0.0  ;;  %v256_v52 = vsel %vm210_vm0, %v250_v47, 0.0 }
  0x45   : > { %v253_v51 = vadd.f32 %v252_v49, %v251_v48 }
  0x47   : > { %v255_v53 = vadd.f32 %v254_v50, %v253_v51 }
  0x49   : > { %v257_v54 = vadd.f32 %v256_v52, %v255_v53 }
  0x4b   : > { %v258_v55 = vsel %vm210_vm0, %v257_v54, 0.0 }
  0x4c   : > { %259 = vadd.xlane.f32.xlu0 %v258_v55 }
  0xd5   : > { %v260_v56 = vpop.xlane.xlu0 %259 }
  0xd6   : > { %v261_v57 = vrot.slane %v260_v56, 4 }
  0xd8   : > { %v262_v58 = vadd.f32 %v261_v57, %v260_v56 }
  0xda   : > { %v263_v59 = vrot.slane %v262_v58, 2 }
  0xdc   : > { %v264_v60 = vadd.f32 %v263_v59, %v262_v58 }
  0xde   : > { %v265_v61 = vrot.slane %v264_v60, 1 }
  0xe0   : > { %v266_v62 = vadd.f32 %v265_v61, %v264_v60 }
  0xe2   : > { %373 = vpush %v266_v62 }
 0x113   : > { %s374_s23 = spop %373 }
 0x114   : > { %v268_v63 = vstv %s374_s23 }
 0x115   : > { %270 = vst.msk [vmem:[%s201_s22] sm:$0x1] %vm269_vm1, %v268_v63 }
 0x116 PF: > { %s12_s11 = sadd.s32 1, %s431_s11   ;;  %s508_s9 = smov %s427_s10 }
 0x117   : > { %p9_p5 = scmp.ge.s32.totalorder %s12_s11, 4   ;;  %s509_s10 = smov %s511_s12 }
 0x119   :  { %11 = sbr.rel (!%p9_p5) target bundleno = 2 (0x2), region = 61 }

</bundles_post_ra>
